<compile_context>
chip_gen: v7x
topology: tpu7x:2x2x1
jax: 0.10.0
libtpu: 0.0.40
codegen_flags: <defaults>
</compile_context>

<pallas_src>
import jax
import jax.numpy as jnp
from jax.experimental import pallas as pl
from jax.experimental.pallas import tpu as pltpu


_TARGET_BLOCK_BYTES = 4 * 1024 * 1024   # ~4 MiB per input block per grid step


def _round_up(x, m):
    return (x + m - 1) // m * m


def _make_kernel(gn, n_tiles, tail_valid):
    """Kernel with compile-time constants closed over.

    gn         : inner (reduction) grid size per parallel group.
    n_tiles    : total number of lane tiles (grid_p * gn).
    tail_valid : valid lane count of the last tile, or None if it is full.
    """
    has_tail = tail_valid is not None

    def kernel(x_ref, y_ref, o_ref):
        p = pl.program_id(0)
        k = pl.program_id(1)

        @pl.when(k == 0)
        def _init():
            o_ref[...] = jnp.zeros_like(o_ref)

        # Cast under the DMA; bf16 stays bf16 in HBM.
        x = x_ref[...].astype(jnp.float32)
        y = y_ref[...].astype(jnp.float32)

        def accumulate(xv, yv):
            # Lane-axis partial reductions, accumulated into the resident
            # (1, 5, D0, D1) output block (classic pl.when accumulator).
            o_ref[0, 0] += jnp.sum(xv, axis=2)
            o_ref[0, 1] += jnp.sum(yv, axis=2)
            o_ref[0, 2] += jnp.sum(xv * yv, axis=2)
            o_ref[0, 3] += jnp.sum(xv * xv, axis=2)
            o_ref[0, 4] += jnp.sum(yv * yv, axis=2)

        if has_tail:                      # static python branch
            t = p * gn + k                # global lane-tile index
            is_tail = t == (n_tiles - 1)

            @pl.when(is_tail)
            def _tail():
                lane = jax.lax.broadcasted_iota(jnp.int32, x.shape, 2)
                m = lane < tail_valid
                accumulate(jnp.where(m, x, 0.0), jnp.where(m, y, 0.0))

            @pl.when(jnp.logical_not(is_tail))
            def _body():
                accumulate(x, y)
        else:
            accumulate(x, y)

    return kernel


def neg_pearson(preds, labels, *, target_block_bytes=_TARGET_BLOCK_BYTES):
    """preds, labels: (B, N) arrays (f32 / bf16). Returns scalar f32 loss."""
    assert preds.shape == labels.shape, (preds.shape, labels.shape)
    B, N = preds.shape
    itemsize = jnp.dtype(preds.dtype).itemsize
    pack = max(8, 32 // max(itemsize, 1))    # dtype-aware sublane packing

    # ---- choose a free-reshape 3-D view (D0, D1, nf) of the (B, N) inputs ---
    fold = 1
    if B < pack and N >= 2:
        for s in range(min(pack, N), 1, -1):
            if N % s == 0:
                fold = s
                break
    if fold > 1:
        D0, D1, nf = B, fold, N // fold      # (B, fold, N/fold)
    else:
        D0, D1, nf = 1, B, N                 # (1, B, N): rows on sublanes
    x3 = preds.reshape(D0, D1, nf)
    y3 = labels.reshape(D0, D1, nf)

    # ---- adaptive lane-tile size (multiple of 128 unless it is the full dim)
    row_bytes = D0 * D1 * itemsize           # bytes per lane slice, per input
    total_bytes = row_bytes * nf              # bytes per input
    small_cutoff = min(1024 * 1024, target_block_bytes)
    if total_bytes <= small_cutoff or nf <= 128:
        tn = nf                               # single full block
    else:
        tn = max(128, (target_block_bytes // row_bytes) // 128 * 128)
        # keep >=2 (>=4 when there is plenty of data) pipeline steps
        min_tiles = 4 if total_bytes >= 4 * target_block_bytes else 2
        tn = min(tn, max(128, _round_up(pl.cdiv(nf, min_tiles), 128)))
        if tn >= nf:
            tn = nf
    n_tiles = pl.cdiv(nf, tn)

    # ---- megacore (v7x) split of the reduction: only when it divides evenly
    grid_p = 1
    if n_tiles >= 4:
        if n_tiles % 2 == 1:
            for cand in (tn + 128, tn - 128, tn + 256, tn - 256):
                if 128 <= cand < nf:
                    nt = pl.cdiv(nf, cand)
                    if nt >= 4 and nt % 2 == 0:
                        tn, n_tiles = cand, nt
                        break
        if n_tiles % 2 == 0:
            grid_p = 2
    gn = n_tiles // grid_p

    tail = nf - (n_tiles - 1) * tn
    tail_valid = None if tail == tn else tail

    block_bytes = D0 * D1 * tn * itemsize
    vmem_limit = int(min(48 * 1024 * 1024,
                         max(32 * 1024 * 1024, 6 * block_bytes)))

    cost = pl.CostEstimate(
        flops=8 * B * N,
        transcendentals=0,
        bytes_accessed=2 * B * N * itemsize + grid_p * 5 * D0 * D1 * 4,
    )

    parts = pl.pallas_call(
        _make_kernel(gn, n_tiles, tail_valid),
        out_shape=jax.ShapeDtypeStruct((grid_p, 5, D0, D1), jnp.float32),
        grid=(grid_p, gn),
        in_specs=[
            pl.BlockSpec((D0, D1, tn), lambda p, k: (0, 0, p * gn + k)),
            pl.BlockSpec((D0, D1, tn), lambda p, k: (0, 0, p * gn + k)),
        ],
        out_specs=pl.BlockSpec((1, 5, D0, D1), lambda p, k: (p, 0, 0, 0)),
        compiler_params=pltpu.CompilerParams(
            dimension_semantics=("parallel", "arbitrary"),
            vmem_limit_bytes=vmem_limit,
        ),
        cost_estimate=cost,
    )(x3, y3)

    # ---- tiny epilogue (O(B) work) in plain JAX ----------------------------
    sums = jnp.sum(parts, axis=0)             # (5, D0, D1)
    if fold > 1:
        row = jnp.sum(sums, axis=2)            # (5, B): collapse sublane fold
    else:
        row = sums[:, 0, :]                    # (5, B)
    sum_x, sum_y, sum_xy, sum_x2, sum_y2 = row
    n = jnp.float32(N)
    num = n * sum_xy - sum_x * sum_y
    den = (n * sum_x2 - sum_x * sum_x) * (n * sum_y2 - sum_y * sum_y)
    pearson = num / jnp.sqrt(den)              # same formula as the PyTorch ref
    return jnp.mean(1.0 - pearson)


def neg_pearson_ref(preds, labels):
    """Pure-JAX reference mirroring the PyTorch loop."""
    x = preds.astype(jnp.float32)
    y = labels.astype(jnp.float32)
    n = x.shape[1]
    sum_x = jnp.sum(x, axis=1)
    sum_y = jnp.sum(y, axis=1)
    sum_xy = jnp.sum(x * y, axis=1)
    sum_x2 = jnp.sum(x * x, axis=1)
    sum_y2 = jnp.sum(y * y, axis=1)
    pearson = (n * sum_xy - sum_x * sum_y) / jnp.sqrt(
        (n * sum_x2 - sum_x**2) * (n * sum_y2 - sum_y**2))
    return jnp.mean(1.0 - pearson)


if __name__ == "__main__":
    key = jax.random.PRNGKey(0)
    k1, k2, k3, k4, k5, k6, k7, k8 = jax.random.split(key, 8)

    # Case A: typical small rPPG batch, even N -> dense sublane fold, 1 block.
    pa = jax.random.normal(k1, (4, 512), dtype=jnp.float32)
    la = 0.5 * pa + 0.5 * jax.random.normal(k2, (4, 512), dtype=jnp.float32)
    outa = jax.block_until_ready(neg_pearson(pa, la))
    refa = neg_pearson_ref(pa, la)
    assert jnp.allclose(outa, refa, atol=1e-5, rtol=1e-4), (outa, refa)

    # Case B: tiny target block -> multi-step reduction grid, masked ragged
    # tail tile and the 2-way "parallel" megacore split.
    pb = jax.random.normal(k3, (2, 4000), dtype=jnp.float32)
    lb = 0.25 * pb + jax.random.normal(k4, (2, 4000), dtype=jnp.float32)
    outb = jax.block_until_ready(neg_pearson(pb, lb, target_block_bytes=4096))
    refb = neg_pearson_ref(pb, lb)
    assert jnp.allclose(outb, refb, atol=1e-5, rtol=1e-4), (outb, refb)

    # Case C: prime N (no fold divides it) -> rows-on-sublanes layout, no pad.
    pc = jax.random.normal(k5, (3, 257), dtype=jnp.float32)
    lc = -pc + 0.1 * jax.random.normal(k6, (3, 257), dtype=jnp.float32)
    outc = jax.block_until_ready(neg_pearson(pc, lc))
    refc = neg_pearson_ref(pc, lc)
    assert jnp.allclose(outc, refc, atol=1e-5, rtol=1e-4), (outc, refc)

    # Case D: bf16 inputs stay bf16 in HBM, 16-row sublane fold, on-chip cast.
    pd = jax.random.normal(k7, (5, 640), dtype=jnp.bfloat16)
    ld = (0.5 * pd.astype(jnp.float32)
          + 0.5 * jax.random.normal(k8, (5, 640), dtype=jnp.float32)
          ).astype(jnp.bfloat16)
    outd = jax.block_until_ready(neg_pearson(pd, ld))
    refd = neg_pearson_ref(pd, ld)
    assert jnp.allclose(outd, refd, atol=2e-3, rtol=2e-3), (outd, refd)

    print("KERNEL_OK")
</pallas_src>

<mosaic_0001>
module attributes {stable_mosaic.version = 11 : i64} {
  func.func @kernel(%arg0: i32, %arg1: i32, %arg2: memref<4x8x64xf32, #tpu.memory_space<vmem>>, %arg3: memref<4x8x64xf32, #tpu.memory_space<vmem>>, %arg4: memref<1x5x4x8xf32, #tpu.memory_space<vmem>>) attributes {dimension_semantics = [#tpu.dimension_semantics<parallel>, #tpu.dimension_semantics<arbitrary>], iteration_bounds = array<i64: 1, 1>, scalar_prefetch = 0 : i64, scratch_operands = 0 : i64, tpu.core_type = #tpu.core_type<tc>, window_params = [{transform_indices = @transform_0, window_bounds = array<i64: 4, 8, 64>}, {transform_indices = @transform_1, window_bounds = array<i64: 4, 8, 64>}, {transform_indices = @transform_2, window_bounds = array<i64: 1, 5, 4, 8>}]} {
    %c0_i32 = arith.constant 0 : i32
    %0 = arith.cmpi eq, %arg1, %c0_i32 : i32
    %1 = arith.extui %0 : i1 to i32
    %c0_i32_0 = arith.constant 0 : i32
    %2 = arith.cmpi ne, %1, %c0_i32_0 : i32
    scf.if %2 {
      %cst_46 = arith.constant 0.000000e+00 : f32
      %43 = vector.broadcast %cst_46 : f32 to vector<1x5x4x8xf32>
      %c0_47 = arith.constant 0 : index
      %c0_48 = arith.constant 0 : index
      %c0_49 = arith.constant 0 : index
      %c0_50 = arith.constant 0 : index
      %44 = vector.load %arg4[%c0_47, %c0_48, %c0_49, %c0_50] : memref<1x5x4x8xf32, #tpu.memory_space<vmem>>, vector<1x5x4x8xf32>
      tpu.vector_store %arg4[%c0_47, %c0_48, %c0_49, %c0_50], %43 {strides = array<i32>} : memref<1x5x4x8xf32, #tpu.memory_space<vmem>>, vector<1x5x4x8xf32>,
    } else {
    }
    %c0 = arith.constant 0 : index
    %c0_1 = arith.constant 0 : index
    %c0_2 = arith.constant 0 : index
    %3 = vector.load %arg2[%c0, %c0_1, %c0_2] : memref<4x8x64xf32, #tpu.memory_space<vmem>>, vector<4x8x64xf32>
    %c0_3 = arith.constant 0 : index
    %c0_4 = arith.constant 0 : index
    %c0_5 = arith.constant 0 : index
    %4 = vector.load %arg3[%c0_3, %c0_4, %c0_5] : memref<4x8x64xf32, #tpu.memory_space<vmem>>, vector<4x8x64xf32>
    %c0_6 = arith.constant 0 : index
    %c0_7 = arith.constant 0 : index
    %c0_8 = arith.constant 0 : index
    %c0_9 = arith.constant 0 : index
    %5 = vector.load %arg4[%c0_6, %c0_7, %c0_8, %c0_9] : memref<1x5x4x8xf32, #tpu.memory_space<vmem>>, vector<1x1x4x8xf32>
    %6 = vector.shape_cast %5 : vector<1x1x4x8xf32> to vector<4x8xf32>
    %cst = arith.constant dense<0.000000e+00> : vector<4x8xf32>
    %7 = vector.multi_reduction <add>, %3, %cst [2] : vector<4x8x64xf32> to vector<4x8xf32>
    %8 = arith.addf %6, %7 : vector<4x8xf32>
    %c0_10 = arith.constant 0 : index
    %c0_11 = arith.constant 0 : index
    %c0_12 = arith.constant 0 : index
    %c0_13 = arith.constant 0 : index
    %9 = vector.load %arg4[%c0_10, %c0_11, %c0_12, %c0_13] : memref<1x5x4x8xf32, #tpu.memory_space<vmem>>, vector<1x1x4x8xf32>
    %10 = vector.shape_cast %9 : vector<1x1x4x8xf32> to vector<4x8xf32>
    %11 = vector.shape_cast %8 : vector<4x8xf32> to vector<1x1x4x8xf32>
    tpu.vector_store %arg4[%c0_10, %c0_11, %c0_12, %c0_13], %11 {strides = array<i32>} : memref<1x5x4x8xf32, #tpu.memory_space<vmem>>, vector<1x1x4x8xf32>,
    %c0_14 = arith.constant 0 : index
    %c1 = arith.constant 1 : index
    %c0_15 = arith.constant 0 : index
    %c0_16 = arith.constant 0 : index
    %12 = vector.load %arg4[%c0_14, %c1, %c0_15, %c0_16] : memref<1x5x4x8xf32, #tpu.memory_space<vmem>>, vector<1x1x4x8xf32>
    %13 = vector.shape_cast %12 : vector<1x1x4x8xf32> to vector<4x8xf32>
    %cst_17 = arith.constant dense<0.000000e+00> : vector<4x8xf32>
    %14 = vector.multi_reduction <add>, %4, %cst_17 [2] : vector<4x8x64xf32> to vector<4x8xf32>
    %15 = arith.addf %13, %14 : vector<4x8xf32>
    %c0_18 = arith.constant 0 : index
    %c1_19 = arith.constant 1 : index
    %c0_20 = arith.constant 0 : index
    %c0_21 = arith.constant 0 : index
    %16 = vector.load %arg4[%c0_18, %c1_19, %c0_20, %c0_21] : memref<1x5x4x8xf32, #tpu.memory_space<vmem>>, vector<1x1x4x8xf32>
    %17 = vector.shape_cast %16 : vector<1x1x4x8xf32> to vector<4x8xf32>
    %18 = vector.shape_cast %15 : vector<4x8xf32> to vector<1x1x4x8xf32>
    tpu.vector_store %arg4[%c0_18, %c1_19, %c0_20, %c0_21], %18 {strides = array<i32>} : memref<1x5x4x8xf32, #tpu.memory_space<vmem>>, vector<1x1x4x8xf32>,
    %c0_22 = arith.constant 0 : index
    %c2 = arith.constant 2 : index
    %c0_23 = arith.constant 0 : index
    %c0_24 = arith.constant 0 : index
    %19 = vector.load %arg4[%c0_22, %c2, %c0_23, %c0_24] : memref<1x5x4x8xf32, #tpu.memory_space<vmem>>, vector<1x1x4x8xf32>
    %20 = vector.shape_cast %19 : vector<1x1x4x8xf32> to vector<4x8xf32>
    %21 = arith.mulf %3, %4 : vector<4x8x64xf32>
    %cst_25 = arith.constant dense<0.000000e+00> : vector<4x8xf32>
    %22 = vector.multi_reduction <add>, %21, %cst_25 [2] : vector<4x8x64xf32> to vector<4x8xf32>
    %23 = arith.addf %20, %22 : vector<4x8xf32>
    %c0_26 = arith.constant 0 : index
    %c2_27 = arith.constant 2 : index
    %c0_28 = arith.constant 0 : index
    %c0_29 = arith.constant 0 : index
    %24 = vector.load %arg4[%c0_26, %c2_27, %c0_28, %c0_29] : memref<1x5x4x8xf32, #tpu.memory_space<vmem>>, vector<1x1x4x8xf32>
    %25 = vector.shape_cast %24 : vector<1x1x4x8xf32> to vector<4x8xf32>
    %26 = vector.shape_cast %23 : vector<4x8xf32> to vector<1x1x4x8xf32>
    tpu.vector_store %arg4[%c0_26, %c2_27, %c0_28, %c0_29], %26 {strides = array<i32>} : memref<1x5x4x8xf32, #tpu.memory_space<vmem>>, vector<1x1x4x8xf32>,
    %c0_30 = arith.constant 0 : index
    %c3 = arith.constant 3 : index
    %c0_31 = arith.constant 0 : index
    %c0_32 = arith.constant 0 : index
    %27 = vector.load %arg4[%c0_30, %c3, %c0_31, %c0_32] : memref<1x5x4x8xf32, #tpu.memory_space<vmem>>, vector<1x1x4x8xf32>
    %28 = vector.shape_cast %27 : vector<1x1x4x8xf32> to vector<4x8xf32>
    %29 = arith.mulf %3, %3 : vector<4x8x64xf32>
    %cst_33 = arith.constant dense<0.000000e+00> : vector<4x8xf32>
    %30 = vector.multi_reduction <add>, %29, %cst_33 [2] : vector<4x8x64xf32> to vector<4x8xf32>
    %31 = arith.addf %28, %30 : vector<4x8xf32>
    %c0_34 = arith.constant 0 : index
    %c3_35 = arith.constant 3 : index
    %c0_36 = arith.constant 0 : index
    %c0_37 = arith.constant 0 : index
    %32 = vector.load %arg4[%c0_34, %c3_35, %c0_36, %c0_37] : memref<1x5x4x8xf32, #tpu.memory_space<vmem>>, vector<1x1x4x8xf32>
    %33 = vector.shape_cast %32 : vector<1x1x4x8xf32> to vector<4x8xf32>
    %34 = vector.shape_cast %31 : vector<4x8xf32> to vector<1x1x4x8xf32>
    tpu.vector_store %arg4[%c0_34, %c3_35, %c0_36, %c0_37], %34 {strides = array<i32>} : memref<1x5x4x8xf32, #tpu.memory_space<vmem>>, vector<1x1x4x8xf32>,
    %c0_38 = arith.constant 0 : index
    %c4 = arith.constant 4 : index
    %c0_39 = arith.constant 0 : index
    %c0_40 = arith.constant 0 : index
    %35 = vector.load %arg4[%c0_38, %c4, %c0_39, %c0_40] : memref<1x5x4x8xf32, #tpu.memory_space<vmem>>, vector<1x1x4x8xf32>
    %36 = vector.shape_cast %35 : vector<1x1x4x8xf32> to vector<4x8xf32>
    %37 = arith.mulf %4, %4 : vector<4x8x64xf32>
    %cst_41 = arith.constant dense<0.000000e+00> : vector<4x8xf32>
    %38 = vector.multi_reduction <add>, %37, %cst_41 [2] : vector<4x8x64xf32> to vector<4x8xf32>
    %39 = arith.addf %36, %38 : vector<4x8xf32>
    %c0_42 = arith.constant 0 : index
    %c4_43 = arith.constant 4 : index
    %c0_44 = arith.constant 0 : index
    %c0_45 = arith.constant 0 : index
    %40 = vector.load %arg4[%c0_42, %c4_43, %c0_44, %c0_45] : memref<1x5x4x8xf32, #tpu.memory_space<vmem>>, vector<1x1x4x8xf32>
    %41 = vector.shape_cast %40 : vector<1x1x4x8xf32> to vector<4x8xf32>
    %42 = vector.shape_cast %39 : vector<4x8xf32> to vector<1x1x4x8xf32>
    tpu.vector_store %arg4[%c0_42, %c4_43, %c0_44, %c0_45], %42 {strides = array<i32>} : memref<1x5x4x8xf32, #tpu.memory_space<vmem>>, vector<1x1x4x8xf32>,
    return
  }
  func.func @transform_0(%arg0: i32, %arg1: i32) -> (i32, i32, i32) {
    %c1_i32 = arith.constant 1 : i32
    %0 = arith.muli %arg0, %c1_i32 : i32
    %1 = arith.addi %0, %arg1 : i32
    %c0_i32 = arith.constant 0 : i32
    %c0_i32_0 = arith.constant 0 : i32
    %c0_i32_1 = arith.constant 0 : i32
    return %c0_i32, %c0_i32_0, %1 : i32, i32, i32
  }
  func.func @transform_1(%arg0: i32, %arg1: i32) -> (i32, i32, i32) {
    %c1_i32 = arith.constant 1 : i32
    %0 = arith.muli %arg0, %c1_i32 : i32
    %1 = arith.addi %0, %arg1 : i32
    %c0_i32 = arith.constant 0 : i32
    %c0_i32_0 = arith.constant 0 : i32
    %c0_i32_1 = arith.constant 0 : i32
    return %c0_i32, %c0_i32_0, %1 : i32, i32, i32
  }
  func.func @transform_2(%arg0: i32, %arg1: i32) -> (i32, i32, i32, i32) {
    %c0_i32 = arith.constant 0 : i32
    %c0_i32_0 = arith.constant 0 : i32
    %c0_i32_1 = arith.constant 0 : i32
    %c0_i32_2 = arith.constant 0 : i32
    return %arg0, %c0_i32, %c0_i32_0, %c0_i32_1 : i32, i32, i32, i32
  }
}

</mosaic_0001>

<bundles_post_ra>
// kernel: tpu_custom_call.1
= control target key start
LH: loop header
LB: loop body
LE: loop exit
PB: predicated region body
PF: predicated region fallthrough
CT: control target
= control target key end

     0   :  { %7 = vsyncpa [#allocation3], 0  ;;  %s486_s0 = inlined_call_operand.hbm [shape: f32[4,8,64], index: 0, kind: input, shape index: {}]   ;;  %s487_s1 = inlined_call_operand.hbm [shape: f32[4,8,64], index: 1, kind: input, shape index: {}]   ;;  %s488_s2 = inlined_call_operand.hbm [shape: f32[1,5,4,8], index: 2, kind: output, shape index: {}]  }
   0x1   :  { %8 = vsyncpa [#allocation6], 0 }
   0x2   :  { %9 = vsyncpa [#allocation4], 0  ;;  %s382_s9 = smov [#allocation2]   ;;  %s310_s13 = scalar_lea.hbm %s486_s0, 512 }
   0x3   :  { %s18_s10 = sshll.u32 %s382_s9, 4  ;;  %p311_p0 = scmp.ne.s32.totalorder %s486_s0, %s310_s13  ;;  %s19_s10 = int_to_ptr.vmem [resolvable:$true] %s18_s10 }
   0x4   :  { %p314_p1 = scmp.lt.u32.totalorder %s310_s13, %s486_s0 }
   0x6   :  { %p316_p2 = pnand %p314_p1, %p311_p0 }
   0x8   :  { %319 = shalt.err (!%p316_p2)
}
   0x9   :  { %s320_s18 = scalar_lea.vmem %s19_s10, 512  ;;  %p325_p4 = scmp.lt.s32.totalorder %s19_s10, %s19_s10 }
   0xa   :  { %p321_p3 = scmp.ne.s32.totalorder %s19_s10, %s320_s18  ;;  %p326_p5 = scmp.lt.s32.totalorder %s320_s18, %s320_s18 }
   0xc   :  { %p327_p6 = por %p326_p5, %p325_p4 }
   0xe   :  { %p328_p7 = pnand %p327_p6, %p321_p3 }
  0x10   :  { %331 = shalt.err (!%p328_p7)
}
  0x11   :  { %s383_s19 = smov 128   ;;  %s384_s20 = smov 8  }
  0x12   :  { %24 = dma.hbm_to_vmem [thread:$0]  %s486_s0, 512, %s19_s10, [#allocation3], %s383_s19, %s383_s19, %s384_s20  }
  0x13   :  { %s385_s23 = smov [#allocation5]   ;;  %s332_s27 = scalar_lea.hbm %s487_s1, 512 }
  0x14   :  { %s33_s24 = sshll.u32 %s385_s23, 4  ;;  %p333_p8 = scmp.ne.s32.totalorder %s487_s1, %s332_s27  ;;  %s34_s24 = int_to_ptr.vmem [resolvable:$true] %s33_s24 }
  0x15   :  { %p336_p9 = scmp.lt.u32.totalorder %s332_s27, %s487_s1 }
  0x17   :  { %p338_p10 = pnand %p336_p9, %p333_p8 }
  0x19   :  { %341 = shalt.err (!%p338_p10)
}
  0x1a   :  { %s342_s4 = scalar_lea.vmem %s34_s24, 512  ;;  %p347_p12 = scmp.lt.s32.totalorder %s34_s24, %s34_s24 }
  0x1b   :  { %p343_p11 = scmp.ne.s32.totalorder %s34_s24, %s342_s4  ;;  %p348_p13 = scmp.lt.s32.totalorder %s342_s4, %s342_s4 }
  0x1d   :  { %p349_p0 = por %p348_p13, %p347_p12 }
  0x1f   :  { %p350_p1 = pnand %p349_p0, %p343_p11 }
  0x21   :  { %353 = shalt.err (!%p350_p1)
}
  0x22   :  { %39 = dma.hbm_to_vmem [thread:$0]  %s487_s1, 512, %s34_s24, [#allocation6], %s383_s19, %s383_s19, %s384_s20  }
  0x23   :  { %376 = dma.done.wait [#allocation3], 512  }
  0x24   :  { %377 = vsyncadd [#allocation3], 4294966784 }
  0x25   :  { %378 = dma.done.wait [#allocation6], 512  }
  0x26   :  { %379 = vsyncadd [#allocation6], 4294966784  ;;  %vm67_vm0 = vcmask 523264   ;;  %v62_v0 = vld [vmem:[#allocation5] sm:$0xff]  ;;  %v63_v2 = vld [vmem:[#allocation5 + $0x8] sm:$0xff]  ;;  %vm52_vm1 = vcmask 60416   ;;  %v84_v49 = vlaneseq }
  0x27   :  { %v58_v1 = vld [vmem:[#allocation2] sm:$0xff]  ;;  %v114_v3 = vsel %vm67_vm0, %v62_v0, 0.0  ;;  %v59_v5 = vld [vmem:[#allocation2 + $0x8] sm:$0xff]  ;;  %v117_v6 = vsel %vm67_vm0, %v63_v2, 0.0  ;;  %v243_v16 = vmul.f32 %v63_v2, %v63_v2  ;;  %v242_v17 = vmul.f32 %v62_v0, %v62_v0  ;;  %v64_v20 = vld [vmem:[#allocation5 + $0x10] sm:$0xff]  ;;  %s387_s1 = smov [#allocation7]  }
  0x28   :  { %v68_v4 = vsel %vm67_vm0, %v58_v1, 0.0  ;;  %115 = vadd.xlane.f32.xlu1 %v114_v3  ;;  %v71_v7 = vsel %vm67_vm0, %v59_v5, 0.0  ;;  %v155_v8 = vmul.f32 %v63_v2, %v59_v5  ;;  %v154_v9 = vmul.f32 %v62_v0, %v58_v1  ;;  %v60_v21 = vld [vmem:[#allocation2 + $0x10] sm:$0xff]  ;;  %v61_v29 = vld [vmem:[#allocation2 + $0x18] sm:$0xff]  ;;  %s289_s6 = sshll.u32 %s387_s1, 4  ;;  %s290_s6 = int_to_ptr.vmem [resolvable:$true] %s289_s6 }
  0x29   :  { %69 = vadd.xlane.f32.xlu0 %v68_v4  ;;  %v199_v12 = vmul.f32 %v59_v5, %v59_v5  ;;  %v198_v13 = vmul.f32 %v58_v1, %v58_v1  ;;  %v249_v18 = vsel %vm67_vm0, %v243_v16, 0.0  ;;  %v246_v19 = vsel %vm67_vm0, %v242_v17, 0.0  ;;  %v65_v30 = vld [vmem:[#allocation5 + $0x18] sm:$0xff]  ;;  %s354_s7 = scalar_lea.vmem %s290_s6, 320  ;;  %p359_p3 = scmp.lt.s32.totalorder %s290_s6, %s290_s6 }
  0x2a   :  { %v161_v10 = vsel %vm67_vm0, %v155_v8, 0.0  ;;  %v158_v11 = vsel %vm67_vm0, %v154_v9, 0.0  ;;  %v120_v22 = vsel %vm67_vm0, %v64_v20, 0.0  ;;  %v74_v23 = vsel %vm67_vm0, %v60_v21, 0.0  ;;  %p355_p2 = scmp.ne.s32.totalorder %s290_s6, %s354_s7  ;;  %p360_p4 = scmp.lt.s32.totalorder %s354_s7, %s354_s7 }
  0x2b   :  { %v205_v14 = vsel %vm67_vm0, %v199_v12, 0.0  ;;  %v202_v15 = vsel %vm67_vm0, %v198_v13, 0.0  ;;  %v200_v24 = vmul.f32 %v60_v21, %v60_v21  ;;  %v156_v25 = vmul.f32 %v64_v20, %v60_v21 }
  0x2c   :  { %118 = vadd.xlane.f32.xlu1 %v117_v6  ;;  %v244_v28 = vmul.f32 %v64_v20, %v64_v20  ;;  %v77_v31 = vsel %vm67_vm0, %v61_v29, 0.0  ;;  %v157_v33 = vmul.f32 %v65_v30, %v61_v29  ;;  %v123_v35 = vsel %vm67_vm0, %v65_v30, 0.0  ;;  %p361_p5 = por %p360_p4, %p359_p3 }
  0x2d   :  { %72 = vadd.xlane.f32.xlu0 %v71_v7  ;;  %v208_v26 = vsel %vm67_vm0, %v200_v24, 0.0  ;;  %v164_v27 = vsel %vm67_vm0, %v156_v25, 0.0  ;;  %v245_v36 = vmul.f32 %v65_v30, %v65_v30  ;;  %v201_v37 = vmul.f32 %v61_v29, %v61_v29 }
  0x2e   :  { %v252_v32 = vsel %vm67_vm0, %v244_v28, 0.0  ;;  %v167_v34 = vsel %vm67_vm0, %v157_v33, 0.0  ;;  %v386_v40 = vmov 0.0   ;;  %v85_v52 = vand.u32 127, %v84_v49  ;;  %p362_p6 = pnand %p361_p5, %p355_p2 }
  0x2f   :  { %v255_v38 = vsel %vm67_vm0, %v245_v36, 0.0  ;;  %v211_v39 = vsel %vm67_vm0, %v201_v37, 0.0  ;;  %53 = vst.msk [vmem:[#allocation7] sm:$0xf] %vm52_vm1, %v386_v40  ;;  %54 = vst.msk [vmem:[#allocation7 + $0x4] sm:$0xf] %vm52_vm1, %v386_v40 }
  0x30   :  { %162 = vadd.xlane.f32.xlu1 %v161_v10  ;;  %55 = vst.msk [vmem:[#allocation7 + $0x8] sm:$0xf] %vm52_vm1, %v386_v40  ;;  %56 = vst.msk [vmem:[#allocation7 + $0xc] sm:$0xf] %vm52_vm1, %v386_v40  ;;  %v87_v53 = vshrl.u32 %v84_v49, 7  ;;  %vm102_vm2 = vcmask 1041409  }
  0x31   :  { %159 = vadd.xlane.f32.xlu0 %v158_v11  ;;  %57 = vst.msk [vmem:[#allocation7 + $0x10] sm:$0xf] %vm52_vm1, %v386_v40  ;;  %vm104_vm3 = vcmask 1042434   ;;  %vm106_vm4 = vcmask 1043459  }
  0x32   :  { %v88_v56 = vsub.s32 %v85_v52, %v87_v53 }
  0x34   :  { %206 = vadd.xlane.f32.xlu1 %v205_v14 }
  0x35   :  { %203 = vadd.xlane.f32.xlu0 %v202_v15 }
  0x36   :  { %v66_v5 = vld [vmem:[#allocation7] sm:$0xf] }
  0x37   :  { %v153_v20 = vld [vmem:[#allocation7 + $0x8] sm:$0xf] }
  0x38   :  { %250 = vadd.xlane.f32.xlu1 %v249_v18  ;;  %v241_v36 = vld [vmem:[#allocation7 + $0x10] sm:$0xf] }
  0x39   :  { %247 = vadd.xlane.f32.xlu0 %v246_v19 }
  0x3c   :  { %121 = vadd.xlane.f32.xlu1 %v120_v22  ;;  %v113_v22 = vld [vmem:[#allocation7 + $0x4] sm:$0xf] }
  0x3d   :  { %75 = vadd.xlane.f32.xlu0 %v74_v23 }
  0x40   :  { %209 = vadd.xlane.f32.xlu1 %v208_v26 }
  0x41   :  { %165 = vadd.xlane.f32.xlu0 %v164_v27 }
  0x44   :  { %78 = vadd.xlane.f32.xlu1 %v77_v31 }
  0x45   :  { %253 = vadd.xlane.f32.xlu0 %v252_v32 }
  0x48   :  { %168 = vadd.xlane.f32.xlu1 %v167_v34 }
  0x49   :  { %124 = vadd.xlane.f32.xlu0 %v123_v35 }
  0x4c   :  { %256 = vadd.xlane.f32.xlu1 %v255_v38  ;;  %v197_v38 = vld [vmem:[#allocation7 + $0xc] sm:$0xf] }
  0x4d   :  { %212 = vadd.xlane.f32.xlu0 %v211_v39 }
  0xb5   :  { %v116_v41 = vpop.xlane.xlu1 %115 }
  0xb6   :  { %v70_v42 = vpop.xlane.xlu0 %69  ;;  %v133_v3 = vrot.slane %v116_v41, %v88_v56 }
  0xb7   :  { %v89_v61 = vrot.slane %v70_v42, %v88_v56 }
  0xb9   :  { %v119_v43 = vpop.xlane.xlu1 %118 }
  0xba   :  { %v73_v44 = vpop.xlane.xlu0 %72  ;;  %v137_v62 = vrot.slane %v119_v43, %v88_v56 }
  0xbb   :  { %v93_v59 = vrot.slane %v73_v44, %v88_v56 }
  0xbc   :  { %v146_v10 = vsel %vm102_vm2, %v137_v62, %v133_v3 }
  0xbd   :  { %v163_v45 = vpop.xlane.xlu1 %162  ;;  %v103_v4 = vsel %vm102_vm2, %v93_v59, %v89_v61 }
  0xbe   :  { %v160_v46 = vpop.xlane.xlu0 %159  ;;  %v181_v63 = vrot.slane %v163_v45, %v88_v56 }
  0xbf   :  { %v177_v0 = vrot.slane %v160_v46, %v88_v56 }
  0xc1   :  { %v207_v47 = vpop.xlane.xlu1 %206  ;;  %v190_v12 = vsel %vm102_vm2, %v181_v63, %v177_v0 }
  0xc2   :  { %v204_v48 = vpop.xlane.xlu0 %203  ;;  %v225_v13 = vrot.slane %v207_v47, %v88_v56 }
  0xc3   :  { %v221_v14 = vrot.slane %v204_v48, %v88_v56 }
  0xc5   :  { %v251_v50 = vpop.xlane.xlu1 %250  ;;  %v234_v34 = vsel %vm102_vm2, %v225_v13, %v221_v14 }
  0xc6   :  { %v248_v51 = vpop.xlane.xlu0 %247  ;;  %v269_v18 = vrot.slane %v251_v50, %v88_v56 }
  0xc7   :  { %v265_v19 = vrot.slane %v248_v51, %v88_v56 }
  0xc9   :  { %v122_v54 = vpop.xlane.xlu1 %121  ;;  %v278_v35 = vsel %vm102_vm2, %v269_v18, %v265_v19 }
  0xca   :  { %v76_v55 = vpop.xlane.xlu0 %75  ;;  %v141_v7 = vrot.slane %v122_v54, %v88_v56 }
  0xcb   :  { %v97_v60 = vrot.slane %v76_v55, %v88_v56 }
  0xcc   :  { %v147_v24 = vsel %vm104_vm3, %v141_v7, %v146_v10 }
  0xcd   :  { %v210_v57 = vpop.xlane.xlu1 %209  ;;  %v105_v8 = vsel %vm104_vm3, %v97_v60, %v103_v4 }
  0xce   :  { %v166_v58 = vpop.xlane.xlu0 %165  ;;  %v229_v25 = vrot.slane %v210_v57, %v88_v56 }
  0xcf   :  { %v185_v9 = vrot.slane %v166_v58, %v88_v56 }
  0xd0   :  { %v235_v40 = vsel %vm104_vm3, %v229_v25, %v234_v34 }
  0xd1   :  { %v79_v1 = vpop.xlane.xlu1 %78  ;;  %v191_v26 = vsel %vm104_vm3, %v185_v9, %v190_v12 }
  0xd2   :  { %v254_v2 = vpop.xlane.xlu0 %253  ;;  %v101_v6 = vrot.slane %v79_v1, %v88_v56 }
  0xd3   :  { %v273_v27 = vrot.slane %v254_v2, %v88_v56 }
  0xd4   :  { %v107_v11 = vsel %vm106_vm4, %v101_v6, %v105_v8 }
  0xd5   :  { %v109_v15 = vadd.f32 %v107_v11, %v66_v5  ;;  %v169_v16 = vpop.xlane.xlu1 %168  ;;  %v279_v41 = vsel %vm104_vm3, %v273_v27, %v278_v35 }
  0xd6   :  { %v125_v17 = vpop.xlane.xlu0 %124  ;;  %v189_v21 = vrot.slane %v169_v16, %v88_v56 }
  0xd7   :  { %v145_v23 = vrot.slane %v125_v17, %v88_v56  ;;  %111 = vst.msk [vmem:[#allocation7] sm:$0xf] %vm52_vm1, %v109_v15 }
  0xd8   :  { %v192_v28 = vsel %vm106_vm4, %v189_v21, %v191_v26 }
  0xd9   :  { %v148_v29 = vsel %vm106_vm4, %v145_v23, %v147_v24  ;;  %v194_v30 = vadd.f32 %v192_v28, %v153_v20  ;;  %v257_v32 = vpop.xlane.xlu1 %256 }
  0xda   :  { %v150_v31 = vadd.f32 %v148_v29, %v113_v22  ;;  %v213_v33 = vpop.xlane.xlu0 %212  ;;  %v277_v37 = vrot.slane %v257_v32, %v88_v56 }
  0xdb   :  { %v233_v39 = vrot.slane %v213_v33, %v88_v56  ;;  %195 = vst.msk [vmem:[#allocation7 + $0x8] sm:$0xf] %vm52_vm1, %v194_v30 }
  0xdc   :  { %151 = vst.msk [vmem:[#allocation7 + $0x4] sm:$0xf] %vm52_vm1, %v150_v31  ;;  %v280_v42 = vsel %vm106_vm4, %v277_v37, %v279_v41 }
  0xdd   :  { %v236_v43 = vsel %vm106_vm4, %v233_v39, %v235_v40  ;;  %v282_v44 = vadd.f32 %v280_v42, %v241_v36 }
  0xde   :  { %v238_v45 = vadd.f32 %v236_v43, %v197_v38 }
  0xdf   :  { %283 = vst.msk [vmem:[#allocation7 + $0x10] sm:$0xf] %vm52_vm1, %v282_v44 }
  0xe0   :  { %239 = vst.msk [vmem:[#allocation7 + $0xc] sm:$0xf] %vm52_vm1, %v238_v45 }
  0xe1   :  { %365 = shalt.err (!%p362_p6)
}
  0xe2   :  { %s366_s10 = scalar_lea.hbm %s488_s2, 320 }
  0xe3   :  { %p367_p7 = scmp.ne.s32.totalorder %s488_s2, %s366_s10  ;;  %p370_p8 = scmp.lt.u32.totalorder %s366_s10, %s488_s2 }
  0xe5   :  { %p372_p9 = pnand %p370_p8, %p367_p7 }
  0xe7   :  { %375 = shalt.err (!%p372_p9)
}
  0xe8   :  { %s388_s15 = smov 64   ;;  %s389_s16 = smov 4  }
  0xe9   :  { %295 = dma.vmem_to_hbm [thread:$0]  %s290_s6, 320, %s488_s2, [#allocation4], %s388_s15, %s388_s15, %s389_s16  }
  0xea   :  { %380 = dma.done.wait [#allocation4], 320  }
  0xeb   :  { %381 = vsyncadd [#allocation4], 4294966976 }
  0xec   :  { %299 = vsyncpa [#allocation3], 1 }
  0xed   :  { %300 = vsyncpa [#allocation6], 1 }
  0xee   :  { %301 = vsyncpa [#allocation4], 1 }

</bundles_post_ra>
